<compile_context>
chip_gen: v6e
topology: v6e:2x2x1
jax: 0.10.0
libtpu: 0.0.40
codegen_flags: <defaults>
</compile_context>

<pallas_src>
import jax
import jax.numpy as jnp
from jax.experimental import pallas as pl
from jax.experimental.pallas import tpu as pltpu


def _round_up(x, m):
    return ((x + m - 1) // m) * m


def _vmf_layerwise_kernel(scale_ref, x_ref, w_ref, b_ref, o_ref, acc_ref):
    """One (tm, tn) output tile; grid axis 2 iterates over K (in_features)."""
    k = pl.program_id(2)

    @pl.when(k == 0)
    def _init():
        acc_ref[...] = jnp.zeros_like(acc_ref)

    # MXU matmul on the raw (unnormalized) weight tile: (tm, tk) @ (tk, tn).
    acc_ref[...] += jnp.dot(
        x_ref[...], w_ref[...], preferred_element_type=jnp.float32
    )

    @pl.when(k == pl.num_programs(2) - 1)
    def _finalize():
        # Layerwise normalization == one scalar scale of the matmul result;
        # bias is pre-normalized in the wrapper. Applied once per output tile.
        scale = scale_ref[0, 0]
        o_ref[...] = (acc_ref[...] * scale + b_ref[...]).astype(o_ref.dtype)


def vmf_layerwise_forward(x, weight_mu, bias_mu, in_features, out_features,
                          *, tm=256, tn=256, tk=512):
    """Deterministic vMF_Layerwise forward:
       out = x @ (w_mu/||w_mu||).reshape(In, Out) + b_mu/||b_mu||."""
    B = x.shape[0]
    assert weight_mu.size == in_features * out_features
    assert bias_mu.size == out_features

    f32 = jnp.float32
    # Single layerwise scalar inverse norm over the whole flat weight vector.
    inv_w = jax.lax.rsqrt(jnp.sum(weight_mu.astype(f32) ** 2))
    scale = inv_w.reshape(1, 1).astype(f32)

    # Weight as (K, N) = (in_features, out_features): MXU-friendly RHS,
    # lane dim = out_features, no transposed contraction in the kernel.
    w = weight_mu.reshape(in_features, out_features)

    # Bias normalized once on the wrapper side (global reduction over Out).
    inv_b = jax.lax.rsqrt(jnp.sum(bias_mu.astype(f32) ** 2))
    b = (bias_mu.astype(f32) * inv_b).reshape(1, out_features)

    # Clamp tiles to the (alignment-rounded) problem size.
    tm = min(tm, _round_up(B, 8))
    tn = min(tn, _round_up(out_features, 128))
    tk = min(tk, _round_up(in_features, 128))

    Bp = _round_up(B, tm)
    Np = _round_up(out_features, tn)
    Kp = _round_up(in_features, tk)

    xp = jnp.pad(x, ((0, Bp - B), (0, Kp - in_features)))
    wp = jnp.pad(w, ((0, Kp - in_features), (0, Np - out_features)))
    bp = jnp.pad(b, ((0, 0), (0, Np - out_features)))

    grid = (Bp // tm, Np // tn, Kp // tk)

    out = pl.pallas_call(
        _vmf_layerwise_kernel,
        out_shape=jax.ShapeDtypeStruct((Bp, Np), x.dtype),
        grid=grid,
        in_specs=[
            pl.BlockSpec(memory_space=pltpu.MemorySpace.SMEM),      # scale (1,1)
            pl.BlockSpec((tm, tk), lambda i, j, k: (i, k)),         # x tile
            pl.BlockSpec((tk, tn), lambda i, j, k: (k, j)),         # weight (K,N) tile
            pl.BlockSpec((1, tn), lambda i, j, k: (0, j)),          # normalized bias tile
        ],
        out_specs=pl.BlockSpec((tm, tn), lambda i, j, k: (i, j)),
        scratch_shapes=[pltpu.VMEM((tm, tn), jnp.float32)],
        compiler_params=pltpu.CompilerParams(
            dimension_semantics=("parallel", "parallel", "arbitrary"),
        ),
    )(scale, xp, wp, bp)

    return out[:B, :out_features]


def _reference_forward(x, weight_mu, bias_mu, in_features, out_features):
    w = weight_mu / jnp.linalg.norm(weight_mu)        # layerwise scalar norm
    b = bias_mu / jnp.linalg.norm(bias_mu)
    return x @ w.reshape(in_features, out_features) + b


if __name__ == "__main__":
    key = jax.random.PRNGKey(0)
    k_x, k_w, k_b, k_x2, k_w2, k_b2 = jax.random.split(key, 6)

    # Case 1: small shapes matching the module's F.linear layout.
    batch, in_features, out_features = 8, 32, 16
    x = jax.random.normal(k_x, (batch, in_features), dtype=jnp.float32)
    weight_mu = jax.random.normal(
        k_w, (in_features * out_features,), dtype=jnp.float32)   # flat vMF mean
    bias_mu = jax.random.normal(k_b, (out_features,), dtype=jnp.float32)

    out = vmf_layerwise_forward(x, weight_mu, bias_mu, in_features, out_features)
    out = jax.block_until_ready(out)
    ref = _reference_forward(x, weight_mu, bias_mu, in_features, out_features)
    assert out.shape == (batch, out_features)
    assert jnp.allclose(out, ref, atol=1e-4, rtol=1e-4)

    # Case 2: exercises a multi-step (M, N, K) grid + accumulator + padding.
    batch2, in2, out2 = 16, 300, 200
    x2 = jax.random.normal(k_x2, (batch2, in2), dtype=jnp.float32)
    wmu2 = jax.random.normal(k_w2, (in2 * out2,), dtype=jnp.float32)
    bmu2 = jax.random.normal(k_b2, (out2,), dtype=jnp.float32)

    out2_arr = vmf_layerwise_forward(x2, wmu2, bmu2, in2, out2,
                                     tm=8, tn=128, tk=128)
    out2_arr = jax.block_until_ready(out2_arr)
    ref2 = _reference_forward(x2, wmu2, bmu2, in2, out2)
    assert out2_arr.shape == (batch2, out2)
    assert jnp.allclose(out2_arr, ref2, atol=1e-4, rtol=1e-4)

    print("KERNEL_OK")
</pallas_src>

<mosaic_0001>
module attributes {stable_mosaic.version = 11 : i64} {
  func.func @_vmf_layerwise_kernel(%arg0: i32, %arg1: i32, %arg2: i32, %arg3: memref<1x1xf32, #tpu.memory_space<smem>>, %arg4: memref<8x128xf32, #tpu.memory_space<vmem>>, %arg5: memref<128x128xf32, #tpu.memory_space<vmem>>, %arg6: memref<1x128xf32, #tpu.memory_space<vmem>>, %arg7: memref<8x128xf32, #tpu.memory_space<vmem>>, %arg8: memref<8x128xf32, #tpu.memory_space<vmem>>) attributes {dimension_semantics = [#tpu.dimension_semantics<parallel>, #tpu.dimension_semantics<parallel>, #tpu.dimension_semantics<arbitrary>], iteration_bounds = array<i64: 1, 1, 1>, scalar_prefetch = 0 : i64, scratch_operands = 1 : i64, tpu.core_type = #tpu.core_type<tc>, window_params = [{transform_indices = @transform_0, window_bounds = array<i64: 1, 1>}, {transform_indices = @transform_1, window_bounds = array<i64: 8, 128>}, {transform_indices = @transform_2, window_bounds = array<i64: 128, 128>}, {transform_indices = @transform_3, window_bounds = array<i64: 1, 128>}, {transform_indices = @transform_4, window_bounds = array<i64: 8, 128>}]} {
    %c0_i32 = arith.constant 0 : i32
    %0 = arith.cmpi eq, %arg2, %c0_i32 : i32
    %1 = arith.extui %0 : i1 to i32
    %c0_i32_0 = arith.constant 0 : i32
    %2 = arith.cmpi ne, %1, %c0_i32_0 : i32
    scf.if %2 {
      %cst_10 = arith.constant 0.000000e+00 : f32
      %12 = vector.broadcast %cst_10 : f32 to vector<8x128xf32>
      %c0_11 = arith.constant 0 : index
      %c0_12 = arith.constant 0 : index
      %13 = vector.load %arg8[%c0_11, %c0_12] : memref<8x128xf32, #tpu.memory_space<vmem>>, vector<8x128xf32>
      tpu.vector_store %arg8[%c0_11, %c0_12], %12 {strides = array<i32>} : memref<8x128xf32, #tpu.memory_space<vmem>>, vector<8x128xf32>,
    } else {
    }
    %c0 = arith.constant 0 : index
    %c0_1 = arith.constant 0 : index
    %3 = vector.load %arg8[%c0, %c0_1] : memref<8x128xf32, #tpu.memory_space<vmem>>, vector<8x128xf32>
    %c0_2 = arith.constant 0 : index
    %c0_3 = arith.constant 0 : index
    %4 = vector.load %arg4[%c0_2, %c0_3] : memref<8x128xf32, #tpu.memory_space<vmem>>, vector<8x128xf32>
    %c0_4 = arith.constant 0 : index
    %c0_5 = arith.constant 0 : index
    %5 = vector.load %arg5[%c0_4, %c0_5] : memref<128x128xf32, #tpu.memory_space<vmem>>, vector<128x128xf32>
    %cst = arith.constant dense<0.000000e+00> : vector<8x128xf32>
    %6 = tpu.matmul %4, %5, %cst {dimension_numbers = #tpu.dot_dimension_numbers<[1], [0], [0], [1], [0, 0, 1, 1], [], []>} : vector<8x128xf32>, vector<128x128xf32>, vector<8x128xf32> -> vector<8x128xf32>
    %7 = arith.addf %3, %6 : vector<8x128xf32>
    %c0_6 = arith.constant 0 : index
    %c0_7 = arith.constant 0 : index
    %8 = vector.load %arg8[%c0_6, %c0_7] : memref<8x128xf32, #tpu.memory_space<vmem>>, vector<8x128xf32>
    tpu.vector_store %arg8[%c0_6, %c0_7], %7 {strides = array<i32>} : memref<8x128xf32, #tpu.memory_space<vmem>>, vector<8x128xf32>,
    %c0_i32_8 = arith.constant 0 : i32
    %9 = arith.cmpi eq, %arg2, %c0_i32_8 : i32
    %10 = arith.extui %9 : i1 to i32
    %c0_i32_9 = arith.constant 0 : i32
    %11 = arith.cmpi ne, %10, %c0_i32_9 : i32
    scf.if %11 {
      %c0_10 = arith.constant 0 : index
      %c0_11 = arith.constant 0 : index
      %12 = memref.load %arg3[%c0_10, %c0_11] : memref<1x1xf32, #tpu.memory_space<smem>>
      %c0_12 = arith.constant 0 : index
      %c0_13 = arith.constant 0 : index
      %13 = vector.load %arg8[%c0_12, %c0_13] : memref<8x128xf32, #tpu.memory_space<vmem>>, vector<8x128xf32>
      %14 = vector.broadcast %12 : f32 to vector<8x128xf32>
      %15 = arith.mulf %13, %14 : vector<8x128xf32>
      %c0_14 = arith.constant 0 : index
      %c0_15 = arith.constant 0 : index
      %16 = vector.load %arg6[%c0_14, %c0_15] : memref<1x128xf32, #tpu.memory_space<vmem>>, vector<1x128xf32>
      %17 = vector.broadcast %16 : vector<1x128xf32> to vector<8x128xf32>
      %18 = arith.addf %15, %17 : vector<8x128xf32>
      %c0_16 = arith.constant 0 : index
      %c0_17 = arith.constant 0 : index
      %19 = vector.load %arg7[%c0_16, %c0_17] : memref<8x128xf32, #tpu.memory_space<vmem>>, vector<8x128xf32>
      tpu.vector_store %arg7[%c0_16, %c0_17], %18 {strides = array<i32>} : memref<8x128xf32, #tpu.memory_space<vmem>>, vector<8x128xf32>,
    } else {
    }
    return
  }
  func.func @transform_0(%arg0: i32, %arg1: i32, %arg2: i32) -> (i32, i32) {
    %c0_i32 = arith.constant 0 : i32
    %c0_i32_0 = arith.constant 0 : i32
    %c0_i32_1 = arith.constant 0 : i32
    return %c0_i32, %c0_i32_0 : i32, i32
  }
  func.func @transform_1(%arg0: i32, %arg1: i32, %arg2: i32) -> (i32, i32) {
    %c0_i32 = arith.constant 0 : i32
    return %arg0, %arg2 : i32, i32
  }
  func.func @transform_2(%arg0: i32, %arg1: i32, %arg2: i32) -> (i32, i32) {
    %c0_i32 = arith.constant 0 : i32
    return %arg2, %arg1 : i32, i32
  }
  func.func @transform_3(%arg0: i32, %arg1: i32, %arg2: i32) -> (i32, i32) {
    %c0_i32 = arith.constant 0 : i32
    %c0_i32_0 = arith.constant 0 : i32
    return %c0_i32, %arg1 : i32, i32
  }
  func.func @transform_4(%arg0: i32, %arg1: i32, %arg2: i32) -> (i32, i32) {
    %c0_i32 = arith.constant 0 : i32
    return %arg0, %arg1 : i32, i32
  }
}

</mosaic_0001>

<bundles_post_ra>
// kernel: tpu_custom_call.1
= control target key start
LH: loop header
LB: loop body
LE: loop exit
PB: predicated region body
PF: predicated region fallthrough
CT: control target
= control target key end

     0   :  { %10 = vsyncpa [#allocation5], 0  ;;  %s345_s0 = inlined_call_operand.<no memory space> [shape: f32[1,1], index: 0, kind: input, shape index: {}]   ;;  %s346_s1 = inlined_call_operand.hbm [shape: f32[8,128], index: 1, kind: input, shape index: {}]   ;;  %s347_s2 = inlined_call_operand.hbm [shape: f32[128,128], index: 2, kind: input, shape index: {}]   ;;  %s348_s3 = inlined_call_operand.vmem [shape: f32[1,128], index: 3, kind: input, shape index: {}]   ;;  %s349_s4 = inlined_call_operand.hbm [shape: f32[8,128], index: 4, kind: output, shape index: {}]  }
   0x1   :  { %11 = vsyncpa [#allocation8], 0 }
   0x2   :  { %12 = vsyncpa [#allocation6], 0  ;;  %s298_s15 = smov [#allocation4]   ;;  %s299_s17 = smov [#allocation7]  }
   0x3   :  { %s21_s16 = sshll.u32 %s298_s15, 4  ;;  %s30_s18 = sshll.u32 %s299_s17, 4  ;;  %s22_s16 = int_to_ptr.vmem [resolvable:$true] %s21_s16  ;;  %s31_s18 = int_to_ptr.vmem [resolvable:$true] %s30_s18 }
   0x4   :  { %s240_s19 = scalar_lea.vmem %s22_s16, 128  ;;  %p245_p1 = scmp.lt.s32.totalorder %s22_s16, %s22_s16 }
   0x5   :  { %p241_p0 = scmp.ne.s32.totalorder %s22_s16, %s240_s19  ;;  %p246_p2 = scmp.lt.s32.totalorder %s240_s19, %s240_s19 }
   0x7   :  { %p247_p3 = por %p246_p2, %p245_p1 }
   0x9   :  { %p248_p4 = pnand %p247_p3, %p241_p0 }
   0xb   :  { %251 = shalt.err (!%p248_p4)
}
   0xc   :  { %24 = dma.hbm_to_vmem [thread:$0]  %s346_s1, 128, %s22_s16, [#allocation5]  }
   0xd   :  { %s260_s22 = scalar_lea.vmem %s31_s18, 2048  ;;  %p265_p6 = scmp.lt.s32.totalorder %s31_s18, %s31_s18 }
   0xe   :  { %p261_p5 = scmp.ne.s32.totalorder %s31_s18, %s260_s22  ;;  %p266_p7 = scmp.lt.s32.totalorder %s260_s22, %s260_s22 }
  0x10   :  { %p267_p8 = por %p266_p7, %p265_p6 }
  0x12   :  { %p268_p9 = pnand %p267_p8, %p261_p5 }
  0x14   :  { %271 = shalt.err (!%p268_p9)
}
  0x15   :  { %s300_s23 = smov 128   ;;  %s301_s24 = smov 8  }
  0x16   :  { %36 = dma.hbm_to_vmem [thread:$0]  %s347_s2, 2048, %s31_s18, [#allocation8], %s300_s23, %s300_s23, %s301_s24  }
  0x17   :  { %292 = dma.done.wait [#allocation5], 128  }
  0x18   :  { %293 = vsyncadd [#allocation5], 4294967168 }
  0x19   :  { %294 = dma.done.wait [#allocation8], 2048  }
  0x1a   :  { %295 = vsyncadd [#allocation8], 4294965248  ;;  %v302_v0 = vmov 0.0   ;;  %vm303_vm0 = vmmov 0   ;;  %v67_v1 = vld [vmem:[#allocation7 + $0x78] sm:$0xff]  ;;  %v66_v2 = vld [vmem:[#allocation7 + $0x70] sm:$0xff]  ;;  %v145_v18 = vstv %s345_s0 }
  0x1b   :  { %190 = vmatprep.subr.mxu0 %v302_v0  ;;  %222 = vmatprep.mubr.msk.f32.mxu0 %vm303_vm0, %v302_v0  ;;  %v65_v3 = vld [vmem:[#allocation7 + $0x68] sm:$0xff]  ;;  %v64_v4 = vld [vmem:[#allocation7 + $0x60] sm:$0xff]  ;;  %v63_v5 = vld [vmem:[#allocation7 + $0x58] sm:$0xff]  ;;  %s304_s29 = smov [#allocation9]  }
  0x1c   :  { %191 = vmatpush3.msra.mxu0 %v67_v1  ;;  %v62_v6 = vld [vmem:[#allocation7 + $0x50] sm:$0xff]  ;;  %v61_v7 = vld [vmem:[#allocation7 + $0x48] sm:$0xff]  ;;  %v60_v8 = vld [vmem:[#allocation7 + $0x40] sm:$0xff]  ;;  %s162_s30 = sshll.u32 %s304_s29, 4  ;;  %s163_s30 = int_to_ptr.vmem [resolvable:$true] %s162_s30 }
  0x1d   :  { %192 = vmatprep.subr.mxu0 %v302_v0  ;;  %v59_v9 = vld [vmem:[#allocation7 + $0x38] sm:$0xff]  ;;  %v58_v10 = vld [vmem:[#allocation7 + $0x30] sm:$0xff]  ;;  %v57_v11 = vld [vmem:[#allocation7 + $0x28] sm:$0xff]  ;;  %s272_s5 = scalar_lea.vmem %s163_s30, 128  ;;  %p277_p11 = scmp.lt.s32.totalorder %s163_s30, %s163_s30 }
  0x1e   :  { %193 = vmatpush3.msra.mxu0 %v66_v2  ;;  %v56_v12 = vld [vmem:[#allocation7 + $0x20] sm:$0xff]  ;;  %v55_v13 = vld [vmem:[#allocation7 + $0x18] sm:$0xff]  ;;  %v54_v14 = vld [vmem:[#allocation7 + $0x10] sm:$0xff]  ;;  %p273_p10 = scmp.ne.s32.totalorder %s163_s30, %s272_s5  ;;  %p278_p12 = scmp.lt.s32.totalorder %s272_s5, %s272_s5 }
  0x1f   :  { %194 = vmatprep.subr.mxu0 %v302_v0  ;;  %v53_v15 = vld [vmem:[#allocation7 + $0x8] sm:$0xff]  ;;  %v52_v16 = vld [vmem:[#allocation7] sm:$0xff]  ;;  %v51_v17 = vld [vmem:[#allocation4] sm:$0xff] }
  0x20   :  { %195 = vmatpush3.msra.mxu0 %v65_v3  ;;  %v172_v20 = vld [vmem:[%s348_s3] ss:$0 sm:$0xff]  ;;  %p279_p13 = por %p278_p12, %p277_p11 }
  0x21   :  { %196 = vmatprep.subr.mxu0 %v302_v0 }
  0x22   :  { %197 = vmatpush3.msra.mxu0 %v64_v4  ;;  %p280_p0 = pnand %p279_p13, %p273_p10 }
  0x23   :  { %198 = vmatprep.subr.mxu0 %v302_v0 }
  0x24   :  { %199 = vmatpush3.msra.mxu0 %v63_v5 }
  0x25   :  { %200 = vmatprep.subr.mxu0 %v302_v0 }
  0x26   :  { %201 = vmatpush3.msra.mxu0 %v62_v6 }
  0x27   :  { %202 = vmatprep.subr.mxu0 %v302_v0 }
  0x28   :  { %203 = vmatpush3.msra.mxu0 %v61_v7 }
  0x29   :  { %204 = vmatprep.subr.mxu0 %v302_v0 }
  0x2a   :  { %205 = vmatpush3.msra.mxu0 %v60_v8 }
  0x2b   :  { %206 = vmatprep.subr.mxu0 %v302_v0 }
  0x2c   :  { %207 = vmatpush3.msra.mxu0 %v59_v9 }
  0x2d   :  { %208 = vmatprep.subr.mxu0 %v302_v0 }
  0x2e   :  { %209 = vmatpush3.msra.mxu0 %v58_v10 }
  0x2f   :  { %210 = vmatprep.subr.mxu0 %v302_v0 }
  0x30   :  { %211 = vmatpush3.msra.mxu0 %v57_v11 }
  0x31   :  { %212 = vmatprep.subr.mxu0 %v302_v0 }
  0x32   :  { %213 = vmatpush3.msra.mxu0 %v56_v12 }
  0x33   :  { %214 = vmatprep.subr.mxu0 %v302_v0 }
  0x34   :  { %215 = vmatpush3.msra.mxu0 %v55_v13 }
  0x35   :  { %216 = vmatprep.subr.mxu0 %v302_v0 }
  0x36   :  { %217 = vmatpush3.msra.mxu0 %v54_v14 }
  0x37   :  { %218 = vmatprep.subr.mxu0 %v302_v0 }
  0x38   :  { %219 = vmatpush3.msra.mxu0 %v53_v15 }
  0x39   :  { %220 = vmatprep.subr.mxu0 %v302_v0 }
  0x3a   :  { %221 = vmatpush3.msra.mxu0 %v52_v16 }
  0x3b   :  { %223 = vmatmul.mubr.f32.vlgmr.msra.gmra.mxu0 %v51_v17 }
  0xfb   :  { %v134_v19 = vpop.f32.mrf.mxu0 }
  0xfc   :  { %v146_v21 = vmul.f32 %v145_v18, %v134_v19 }
  0xfd   :  { %v224_v22 = vpop.f32.mrf.mxu0 }
  0xfe   :  { %v154_v23 = vadd.f32 %v172_v20, %v146_v21 }
 0x100   :  { %155 = vst [vmem:[#allocation9] sm:$0xff] %v154_v23 }
 0x101   :  { %283 = shalt.err (!%p280_p0)
}
 0x102   :  { %165 = dma.vmem_to_hbm [thread:$0]  %s163_s30, 128, %s349_s4, [#allocation6]  }
 0x103   :  { %296 = dma.done.wait [#allocation6], 128  }
 0x104   :  { %297 = vsyncadd [#allocation6], 4294967168 }
 0x105   :  { %169 = vsyncpa [#allocation5], 1 }
 0x106   :  { %170 = vsyncpa [#allocation8], 1 }
 0x107   :  { %171 = vsyncpa [#allocation6], 1 }

</bundles_post_ra>
